<compile_context>
chip_gen: v7x
topology: tpu7x:2x2x1
jax: 0.10.0
libtpu: 0.0.40
codegen_flags: <defaults>
</compile_context>

<pallas_src>
import jax
import jax.numpy as jnp
from jax.experimental import pallas as pl
from jax.experimental.pallas import tpu as pltpu

_LANE = 128
_MIB = 1024 * 1024
# Explicit scoped-VMEM request: safe on every generation (v7x has 64 MiB
# physical, v5e/v6e have 128 MiB) and well above in+out double-buffering.
_VMEM_LIMIT_BYTES = 40 * _MIB


def _sublane(dtype) -> int:
    """Minimum second-minor tiling granularity for this dtype."""
    itemsize = jnp.dtype(dtype).itemsize
    return {4: 8, 2: 16, 1: 32}.get(itemsize, 8)


def _tile_bytes() -> int:
    """Per-buffer tile target, generation aware.

    v7x (64 MiB VMEM):  4 MiB tiles -> in+out double-buffered ~16 MiB.
    v5e/v6e (128 MiB):  6 MiB tiles -> ~24 MiB; further amortizes the
                         ~0.35 us fixed per-grid-step pipeline overhead.
    """
    try:
        info = pltpu.get_tpu_info()
        vmem = getattr(info, "vmem_capacity_bytes", None)
        if vmem is not None and vmem >= 96 * _MIB:
            return 6 * _MIB
    except Exception:
        pass
    return 4 * _MIB


def _subtract_const_kernel(const_ref, x_ref, o_ref):
    # const lives in SMEM (one compiled kernel for any const value);
    # compute in the input dtype (matches PyTorch for float x / int const).
    c = const_ref[0].astype(x_ref.dtype)
    o_ref[...] = x_ref[...] - c


def subtract_const(x: jax.Array, const=0, *, force_kernel: bool = False) -> jax.Array:
    """Computes x - const with a Pallas TPU kernel. Preserves shape & dtype."""
    orig_shape = x.shape
    dtype = x.dtype
    total = x.size
    if total == 0:
        return x

    itemsize = jnp.dtype(dtype).itemsize
    sub = _sublane(dtype)
    tile_bytes = _tile_bytes()

    # Sub-tile inputs are launch-overhead dominated: let XLA's fused
    # elementwise op handle them (unless the caller insists on the kernel).
    # Inputs smaller than one lane row always take the JAX path.
    if total < _LANE or (not force_kernel and total * itemsize <= tile_bytes):
        # TODO(synk): integer-x / float-const promotion differs from PyTorch.
        return (x - jnp.asarray(const, dtype=dtype)).astype(dtype)

    # Widest lane-dense last dim (multiple of 128) so stores are unmasked and
    # per-row DMA descriptor count is low. Ragged totals keep the wide lane_w
    # and only the < lane_w remainder goes to the JAX tail path.
    lane_w = _LANE
    for w in (2048, 1024, 512, 256, 128):
        if total >= w:
            lane_w = w
            break

    rows = total // lane_w
    main = rows * lane_w
    tail = total - main

    x_flat = x.reshape(-1)
    x2d = (x_flat[:main] if tail else x_flat).reshape(rows, lane_w)

    # Tile rows: ~tile_bytes per buffer, rounded to a sublane multiple.
    row_bytes = lane_w * itemsize
    target_rows = max(sub, tile_bytes // row_bytes)
    target_rows = (target_rows // sub) * sub
    if rows <= target_rows:
        block_rows = rows  # single full-extent block, grid=(1,)
    else:
        block_rows = target_rows
        n_steps = pl.cdiv(rows, block_rows)
        if n_steps > 1 and n_steps % 2 == 1:
            # Best effort: even step count -> balanced 2-TensorCore split (v7x).
            per = pl.cdiv(rows, n_steps + 1)
            block_rows = max(sub, ((per + sub - 1) // sub) * sub)
    grid = (pl.cdiv(rows, block_rows),)

    # const as an SMEM scalar operand (no per-value recompiles).
    if jnp.issubdtype(dtype, jnp.floating):
        const_arr = jnp.asarray([const], dtype=jnp.float32)
    else:
        const_arr = jnp.asarray([const], dtype=jnp.int32)

    out2d = pl.pallas_call(
        _subtract_const_kernel,
        out_shape=jax.ShapeDtypeStruct((rows, lane_w), dtype),
        grid_spec=pltpu.PrefetchScalarGridSpec(
            num_scalar_prefetch=0,
            grid=grid,
            in_specs=[
                pl.BlockSpec(memory_space=pltpu.MemorySpace.SMEM),  # const
                pl.BlockSpec((block_rows, lane_w), lambda i: (i, 0)),
            ],
            out_specs=pl.BlockSpec((block_rows, lane_w), lambda i: (i, 0)),
        ),
        compiler_params=pltpu.CompilerParams(
            dimension_semantics=("parallel",),
            vmem_limit_bytes=_VMEM_LIMIT_BYTES,
        ),
    )(const_arr, x2d)

    out_flat = out2d.reshape(-1)
    if tail:
        tail_out = (x_flat[main:] - jnp.asarray(const, dtype=dtype)).astype(dtype)
        out_flat = jnp.concatenate([out_flat, tail_out])
    return out_flat.reshape(orig_shape)


if __name__ == "__main__":
    key = jax.random.PRNGKey(0)
    const = 3  # SubtractConst(const=3)

    # Module-sized input (B=2, C=4, H=W=16), forced through the Pallas kernel.
    x = jax.random.normal(key, (2, 4, 16, 16), dtype=jnp.float32)
    y = jax.block_until_ready(subtract_const(x, const, force_kernel=True))
    assert y.shape == x.shape and y.dtype == x.dtype
    assert jnp.allclose(y, x - const, atol=0, rtol=0)

    # Larger multi-tile input exercising the pipelined, multi-step-grid path.
    k1, k2 = jax.random.split(key)
    x_big = jax.random.normal(k1, (8, 512, 1024), dtype=jnp.float32)  # 16 MiB
    y_big = jax.block_until_ready(subtract_const(x_big, const))
    assert jnp.allclose(y_big, x_big - const, atol=0, rtol=0)

    # Ragged flat size (not a multiple of 128): kernel main body + JAX tail.
    x_rag = jax.random.normal(k2, (3, 5, 1000), dtype=jnp.float32)
    y_rag = jax.block_until_ready(subtract_const(x_rag, const, force_kernel=True))
    assert y_rag.shape == x_rag.shape and y_rag.dtype == x_rag.dtype
    assert jnp.allclose(y_rag, x_rag - const, atol=0, rtol=0)

    print("KERNEL_OK")
</pallas_src>

<mosaic_0001>
module attributes {stable_mosaic.version = 11 : i64} {
  func.func @_subtract_const_kernel(%arg0: i32, %arg1: memref<1xf32, #tpu.memory_space<smem>>, %arg2: memref<1x2048xf32, #tpu.memory_space<vmem>>, %arg3: memref<1x2048xf32, #tpu.memory_space<vmem>>) attributes {dimension_semantics = [#tpu.dimension_semantics<parallel>], iteration_bounds = array<i64: 1>, scalar_prefetch = 0 : i64, scratch_operands = 0 : i64, tpu.core_type = #tpu.core_type<tc>, window_params = [{transform_indices = @transform_0, window_bounds = array<i64: 1>}, {transform_indices = @transform_1, window_bounds = array<i64: 1, 2048>}, {transform_indices = @transform_2, window_bounds = array<i64: 1, 2048>}]} {
    %c0 = arith.constant 0 : index
    %0 = memref.load %arg1[%c0] : memref<1xf32, #tpu.memory_space<smem>>
    %c0_0 = arith.constant 0 : index
    %c0_1 = arith.constant 0 : index
    %1 = vector.load %arg2[%c0_0, %c0_1] : memref<1x2048xf32, #tpu.memory_space<vmem>>, vector<1x2048xf32>
    %2 = vector.broadcast %0 : f32 to vector<1x2048xf32>
    %3 = arith.subf %1, %2 : vector<1x2048xf32>
    %c0_2 = arith.constant 0 : index
    %c0_3 = arith.constant 0 : index
    %4 = vector.load %arg3[%c0_2, %c0_3] : memref<1x2048xf32, #tpu.memory_space<vmem>>, vector<1x2048xf32>
    tpu.vector_store %arg3[%c0_2, %c0_3], %3 {strides = array<i32>} : memref<1x2048xf32, #tpu.memory_space<vmem>>, vector<1x2048xf32>,
    return
  }
  func.func @transform_0(%arg0: i32) -> i32 {
    %c0_i32 = arith.constant 0 : i32
    %c0_i32_0 = arith.constant 0 : i32
    return %c0_i32 : i32
  }
  func.func @transform_1(%arg0: i32) -> (i32, i32) {
    %c0_i32 = arith.constant 0 : i32
    %c0_i32_0 = arith.constant 0 : i32
    return %arg0, %c0_i32 : i32, i32
  }
  func.func @transform_2(%arg0: i32) -> (i32, i32) {
    %c0_i32 = arith.constant 0 : i32
    %c0_i32_0 = arith.constant 0 : i32
    return %arg0, %c0_i32 : i32, i32
  }
}

</mosaic_0001>

<bundles_post_ra>
// kernel: tpu_custom_call.1
= control target key start
LH: loop header
LB: loop body
LE: loop exit
PB: predicated region body
PF: predicated region fallthrough
CT: control target
= control target key end

     0   :  { %8 = vsyncpa [#allocation4], 0  ;;  %s142_s0 = inlined_call_operand.<no memory space> [shape: f32[1], index: 0, kind: input, shape index: {}]   ;;  %s143_s1 = inlined_call_operand.hbm [shape: f32[1,2048], index: 1, kind: input, shape index: {}]   ;;  %s144_s2 = inlined_call_operand.hbm [shape: f32[1,2048], index: 2, kind: output, shape index: {}]  }
   0x1   :  { %9 = vsyncpa [#allocation5], 0  ;;  %s98_s9 = smov [#allocation3]   ;;  %s50_s13 = scalar_lea.hbm %s143_s1, 256 }
   0x2   :  { %s18_s10 = sshll.u32 %s98_s9, 4  ;;  %p51_p0 = scmp.ne.s32.totalorder %s143_s1, %s50_s13  ;;  %s19_s10 = int_to_ptr.vmem [resolvable:$true] %s18_s10 }
   0x3   :  { %p54_p1 = scmp.lt.u32.totalorder %s50_s13, %s143_s1 }
   0x5   :  { %p56_p2 = pnand %p54_p1, %p51_p0 }
   0x7   :  { %59 = shalt.err (!%p56_p2)
}
   0x8   :  { %s60_s18 = scalar_lea.vmem %s19_s10, 256  ;;  %p65_p4 = scmp.lt.s32.totalorder %s19_s10, %s19_s10 }
   0x9   :  { %p61_p3 = scmp.ne.s32.totalorder %s19_s10, %s60_s18  ;;  %p66_p5 = scmp.lt.s32.totalorder %s60_s18, %s60_s18 }
   0xb   :  { %p67_p6 = por %p66_p5, %p65_p4 }
   0xd   :  { %p68_p7 = pnand %p67_p6, %p61_p3 }
   0xf   :  { %71 = shalt.err (!%p68_p7)
}
  0x10   :  { %21 = dma.hbm_to_vmem [thread:$0]  %s143_s1, 256, %s19_s10, [#allocation4]  }
  0x11   :  { %94 = dma.done.wait [#allocation4], 256  }
  0x12   :  { %95 = vsyncadd [#allocation4], 4294967040  ;;  %v28_v0 = vstv %s142_s0  ;;  %s99_s23 = smov [#allocation6]   ;;  %v26_v1 = vld [vmem:[#allocation3] sm:$0xff]  ;;  %v27_v2 = vld [vmem:[#allocation3 + $0x8] sm:$0xff] }
  0x13   :  { %s39_s24 = sshll.u32 %s99_s23, 4  ;;  %v29_v3 = vsub.f32 %v26_v1, %v28_v0  ;;  %v30_v4 = vsub.f32 %v27_v2, %v28_v0  ;;  %s40_s24 = int_to_ptr.vmem [resolvable:$true] %s39_s24 }
  0x14   :  { %s72_s25 = scalar_lea.vmem %s40_s24, 256  ;;  %p77_p9 = scmp.lt.s32.totalorder %s40_s24, %s40_s24 }
  0x15   :  { %31 = vst [vmem:[#allocation6] sm:$0xff] %v29_v3  ;;  %32 = vst [vmem:[#allocation6 + $0x8] sm:$0xff] %v30_v4  ;;  %p73_p8 = scmp.ne.s32.totalorder %s40_s24, %s72_s25  ;;  %p78_p10 = scmp.lt.s32.totalorder %s72_s25, %s72_s25 }
  0x17   :  { %p79_p11 = por %p78_p10, %p77_p9 }
  0x19   :  { %p80_p12 = pnand %p79_p11, %p73_p8 }
  0x1b   :  { %83 = shalt.err (!%p80_p12)
}
  0x1c   :  { %s84_s0 = scalar_lea.hbm %s144_s2, 256 }
  0x1d   :  { %p85_p13 = scmp.ne.s32.totalorder %s144_s2, %s84_s0  ;;  %p88_p0 = scmp.lt.u32.totalorder %s84_s0, %s144_s2 }
  0x1f   :  { %p90_p1 = pnand %p88_p0, %p85_p13 }
  0x21   :  { %93 = shalt.err (!%p90_p1)
}
  0x22   :  { %42 = dma.vmem_to_hbm [thread:$0]  %s40_s24, 256, %s144_s2, [#allocation5]  }
  0x23   :  { %96 = dma.done.wait [#allocation5], 256  }
  0x24   :  { %97 = vsyncadd [#allocation5], 4294967040 }
  0x25   :  { %46 = vsyncpa [#allocation4], 1 }
  0x26   :  { %47 = vsyncpa [#allocation5], 1 }

</bundles_post_ra>
